<compile_context>
chip_gen: v7x
topology: tpu7x:2x2x1
jax: 0.10.0
libtpu: 0.0.40
codegen_flags: <defaults>
</compile_context>

<pallas_src>
import math

import jax
import jax.numpy as jnp
from jax.experimental import pallas as pl
from jax.experimental.pallas import tpu as pltpu


def _locked_dropout_kernel(x_ref, mask_ref, o_ref):
    # (tile_r, tile_l) * (1, tile_l) broadcast multiply: one vmul per vreg.
    o_ref[...] = x_ref[...] * mask_ref[...]


def _round_down(n, m):
    return (n // m) * m


def _vmem_capacity_bytes():
    """Per-TensorCore VMEM capacity; conservative fallback if unqueryable."""
    try:
        return int(pltpu.get_tpu_info().vmem_capacity_bytes)
    except Exception:
        return 64 << 20  # v7x per-TC VMEM; safe lower bound for v5e/v6e too.


def _regroup_factor(S, BH):
    """Smallest r with (r*BH) % 128 == 0 and S % r == 0 (else 1 = fallback)."""
    if BH % 128 == 0:
        return 1
    r = 128 // math.gcd(BH, 128)
    if S % r == 0:
        return r
    # Lane-sparse fallback: correct, just slower (masked partial stores).
    return 1


def _plan_tiles(R, L, itemsize, vmem_cap):
    """Pick (tile_r, tile_l, grid_r, grid_l) for an (R, L) elementwise stream."""
    headroom = 16 << 20
    budget = max(vmem_cap - headroom, 8 << 20)
    # Double-buffered input + output blocks = 4x one block.  ~8 MiB blocks
    # amortize the ~0.35 us/step pipeline overhead at v7x bandwidth and are
    # already >= 85% of roofline on v5e/v6e.
    target = min(8 << 20, budget // 4)

    # Lane axis: split fat rows (multiple-of-128 tiles) so the block size is
    # governed by `target`, not by L.
    if L % 128 == 0 and 8 * L * itemsize > target:
        tile_l = max(128, _round_down(target // (8 * itemsize), 128))
        tile_l = min(tile_l, L)
    else:
        tile_l = L

    # Row axis: multiples of 8 (or the full, possibly <8, extent).
    if R < 8:
        tile_r = R
    else:
        tile_r = _round_down(max(target // (tile_l * itemsize), 8), 8)
        tile_r = max(8, tile_r)
        if tile_r >= R:
            tile_r = R

    grid_r = pl.cdiv(R, tile_r)
    grid_l = pl.cdiv(L, tile_l)

    # v7x megacore: ensure >= 2 grid steps when possible so both TensorCores
    # get work under dimension_semantics=("parallel", "parallel").
    if grid_r * grid_l == 1 and R > 8:
        tile_r = max(8, _round_down(pl.cdiv(R, 2), 8))
        grid_r = pl.cdiv(R, tile_r)

    return tile_r, tile_l, grid_r, grid_l


def locked_dropout(x, p=0.5, *, key=None, training=True, donate=False):
    """Forward pass of LockedDropout.

    x: (S, B, H) array.  In training with p > 0, samples one (1, B, H)
    Bernoulli(1-p)/(1-p) mask and multiplies it into every timestep.
    Set donate=True (with a donated x) to alias the output onto x's buffer.
    """
    if not training or p == 0.0:
        return x
    if not (0.0 <= p < 1.0):
        raise ValueError(f"dropout p must be in [0, 1), got {p}")
    if key is None:
        raise ValueError(
            "locked_dropout requires an explicit PRNG key when training with p > 0")

    S, B, H = x.shape
    BH = B * H
    keep = 1.0 - p

    # One "locked" mask shared across the sequence axis (tiny: B*H elements).
    # TODO(synk): generate in-kernel with pltpu.prng_seed/prng_random_bits on
    # hardware; wrapper-side keeps the kernel interpret-mode friendly.
    bern = jax.random.bernoulli(key, keep, (1, BH))
    mask_row = jnp.where(bern,
                         jnp.asarray(1.0 / keep, x.dtype),
                         jnp.asarray(0.0, x.dtype))

    # Lane-dense regrouping: fold r consecutive timesteps into one row so the
    # last (lane) axis is a multiple of 128.
    r = _regroup_factor(S, BH)
    R, L = S // r, r * BH
    x2 = x.reshape(R, L)
    mask2 = jnp.tile(mask_row, (1, r)) if r > 1 else mask_row

    itemsize = jnp.dtype(x.dtype).itemsize
    vmem_cap = _vmem_capacity_bytes()
    tile_r, tile_l, grid_r, grid_l = _plan_tiles(R, L, itemsize, vmem_cap)

    call_kwargs = {}
    if jax.default_backend() == "tpu":
        block_bytes = tile_r * tile_l * itemsize
        # Double-buffered in + out blocks, double-buffered mask row, slack.
        need = 4 * block_bytes + 4 * tile_l * itemsize + (2 << 20)
        vmem_limit = int(min(max(need, 4 << 20), vmem_cap - (8 << 20)))
        call_kwargs["compiler_params"] = pltpu.CompilerParams(
            dimension_semantics=("parallel", "parallel"),
            vmem_limit_bytes=vmem_limit,
        )

    out2 = pl.pallas_call(
        _locked_dropout_kernel,
        out_shape=jax.ShapeDtypeStruct((R, L), x.dtype),
        grid=(grid_r, grid_l),
        in_specs=[
            pl.BlockSpec((tile_r, tile_l), lambda i, j: (i, j)),  # x tile
            pl.BlockSpec((1, tile_l), lambda i, j: (0, j)),       # locked mask
        ],
        out_specs=pl.BlockSpec((tile_r, tile_l), lambda i, j: (i, j)),
        input_output_aliases=({0: 0} if donate else {}),
        **call_kwargs,
    )(x2, mask2)
    return out2.reshape(S, B, H)


if __name__ == "__main__":
    root = jax.random.PRNGKey(0)
    k_x, k_m1, k_x2, k_m2 = jax.random.split(root, 4)

    # Shape consistent with the module: seq=8, batch=2, hidden=32.
    S, B, H = 8, 2, 32
    p = 0.5
    x = jax.random.normal(k_x, (S, B, H), dtype=jnp.float32)

    out = jax.block_until_ready(locked_dropout(x, p=p, key=k_m1, training=True))
    assert out.shape == x.shape and out.dtype == x.dtype

    # Semantics: every element is either zeroed or scaled by exactly 1/keep,
    # and the mask is identical ("locked") across the sequence axis.
    keep = 1.0 - p
    ratio = jnp.where(jnp.abs(x) > 1e-6, out / x, 0.0)
    assert bool(jnp.all((jnp.abs(ratio) < 1e-5) |
                        (jnp.abs(ratio - 1.0 / keep) < 1e-3)))
    assert bool(jnp.all(jnp.abs(ratio - ratio[0:1]) < 1e-3))

    # A second shape that exercises the multi-step (>=2 grid points) path.
    S2, B2, H2 = 32, 4, 64
    x_big = jax.random.normal(k_x2, (S2, B2, H2), dtype=jnp.float32)
    out_big = jax.block_until_ready(
        locked_dropout(x_big, p=0.25, key=k_m2, training=True))
    keep2 = 0.75
    ratio2 = jnp.where(jnp.abs(x_big) > 1e-6, out_big / x_big, 0.0)
    assert bool(jnp.all((jnp.abs(ratio2) < 1e-5) |
                        (jnp.abs(ratio2 - 1.0 / keep2) < 1e-3)))
    assert bool(jnp.all(jnp.abs(ratio2 - ratio2[0:1]) < 1e-3))

    # Eval mode / p == 0 are identity.
    out_eval = jax.block_until_ready(
        locked_dropout(x, p=p, key=k_m1, training=False))
    assert bool(jnp.all(out_eval == x))
    assert bool(jnp.all(locked_dropout(x, p=0.0, key=k_m1, training=True) == x))

    # p >= 1 is rejected (would imply an infinite 1/keep scale).
    try:
        locked_dropout(x, p=1.0, key=k_m1, training=True)
        raise AssertionError("p=1.0 should have been rejected")
    except ValueError:
        pass

    print("KERNEL_OK")
</pallas_src>

<mosaic_0001>
module attributes {stable_mosaic.version = 11 : i64} {
  func.func @_locked_dropout_kernel(%arg0: i32, %arg1: i32, %arg2: memref<4x128xf32, #tpu.memory_space<vmem>>, %arg3: memref<1x128xf32, #tpu.memory_space<vmem>>, %arg4: memref<4x128xf32, #tpu.memory_space<vmem>>) attributes {dimension_semantics = [#tpu.dimension_semantics<arbitrary>, #tpu.dimension_semantics<arbitrary>], iteration_bounds = array<i64: 1, 1>, scalar_prefetch = 0 : i64, scratch_operands = 0 : i64, tpu.core_type = #tpu.core_type<tc>, window_params = [{transform_indices = @transform_0, window_bounds = array<i64: 4, 128>}, {transform_indices = @transform_1, window_bounds = array<i64: 1, 128>}, {transform_indices = @transform_2, window_bounds = array<i64: 4, 128>}]} {
    %c0 = arith.constant 0 : index
    %c0_0 = arith.constant 0 : index
    %0 = vector.load %arg2[%c0, %c0_0] : memref<4x128xf32, #tpu.memory_space<vmem>>, vector<4x128xf32>
    %c0_1 = arith.constant 0 : index
    %c0_2 = arith.constant 0 : index
    %1 = vector.load %arg3[%c0_1, %c0_2] : memref<1x128xf32, #tpu.memory_space<vmem>>, vector<1x128xf32>
    %2 = vector.broadcast %1 : vector<1x128xf32> to vector<4x128xf32>
    %3 = arith.mulf %0, %2 : vector<4x128xf32>
    %c0_3 = arith.constant 0 : index
    %c0_4 = arith.constant 0 : index
    %4 = vector.load %arg4[%c0_3, %c0_4] : memref<4x128xf32, #tpu.memory_space<vmem>>, vector<4x128xf32>
    tpu.vector_store %arg4[%c0_3, %c0_4], %3 {strides = array<i32>} : memref<4x128xf32, #tpu.memory_space<vmem>>, vector<4x128xf32>,
    return
  }
  func.func @transform_0(%arg0: i32, %arg1: i32) -> (i32, i32) {
    %c0_i32 = arith.constant 0 : i32
    return %arg0, %arg1 : i32, i32
  }
  func.func @transform_1(%arg0: i32, %arg1: i32) -> (i32, i32) {
    %c0_i32 = arith.constant 0 : i32
    %c0_i32_0 = arith.constant 0 : i32
    return %c0_i32, %arg1 : i32, i32
  }
  func.func @transform_2(%arg0: i32, %arg1: i32) -> (i32, i32) {
    %c0_i32 = arith.constant 0 : i32
    return %arg0, %arg1 : i32, i32
  }
}

</mosaic_0001>

<bundles_post_ra>
// kernel: tpu_custom_call.1
= control target key start
LH: loop header
LB: loop body
LE: loop exit
PB: predicated region body
PF: predicated region fallthrough
CT: control target
= control target key end

     0   :  { %7 = vsyncpa [#allocation3], 0  ;;  %s144_s0 = inlined_call_operand.hbm [shape: f32[4,128], index: 0, kind: input, shape index: {}]   ;;  %s145_s1 = inlined_call_operand.vmem [shape: f32[1,128], index: 1, kind: input, shape index: {}]   ;;  %s146_s2 = inlined_call_operand.hbm [shape: f32[4,128], index: 2, kind: output, shape index: {}]  }
   0x1   :  { %8 = vsyncpa [#allocation4], 0  ;;  %s100_s9 = smov [#allocation2]   ;;  %s52_s13 = scalar_lea.hbm %s144_s0, 64 }
   0x2   :  { %s15_s10 = sshll.u32 %s100_s9, 4  ;;  %p53_p0 = scmp.ne.s32.totalorder %s144_s0, %s52_s13  ;;  %s16_s10 = int_to_ptr.vmem [resolvable:$true] %s15_s10 }
   0x3   :  { %p56_p1 = scmp.lt.u32.totalorder %s52_s13, %s144_s0 }
   0x5   :  { %p58_p2 = pnand %p56_p1, %p53_p0 }
   0x7   :  { %61 = shalt.err (!%p58_p2)
}
   0x8   :  { %s62_s18 = scalar_lea.vmem %s16_s10, 64  ;;  %p67_p4 = scmp.lt.s32.totalorder %s16_s10, %s16_s10 }
   0x9   :  { %p63_p3 = scmp.ne.s32.totalorder %s16_s10, %s62_s18  ;;  %p68_p5 = scmp.lt.s32.totalorder %s62_s18, %s62_s18 }
   0xb   :  { %p69_p6 = por %p68_p5, %p67_p4 }
   0xd   :  { %p70_p7 = pnand %p69_p6, %p63_p3 }
   0xf   :  { %73 = shalt.err (!%p70_p7)
}
  0x10   :  { %18 = dma.hbm_to_vmem [thread:$0]  %s144_s0, 64, %s16_s10, [#allocation3]  }
  0x11   :  { %96 = dma.done.wait [#allocation3], 64  }
  0x12   :  { %97 = vsyncadd [#allocation3], 4294967232  ;;  %s101_s21 = smov [#allocation5]   ;;  %v24_v0 = vld [vmem:[#allocation2] sm:$0xf] }
  0x13   :  { %s40_s22 = sshll.u32 %s101_s21, 4  ;;  %v49_v1 = vld [vmem:[%s145_s1] ss:$0 sm:$0xff]  ;;  %s41_s22 = int_to_ptr.vmem [resolvable:$true] %s40_s22 }
  0x14   :  { %v32_v2 = vmul.f32 %v49_v1, %v24_v0  ;;  %s74_s25 = scalar_lea.vmem %s41_s22, 64  ;;  %p79_p9 = scmp.lt.s32.totalorder %s41_s22, %s41_s22 }
  0x15   :  { %p75_p8 = scmp.ne.s32.totalorder %s41_s22, %s74_s25  ;;  %p80_p10 = scmp.lt.s32.totalorder %s74_s25, %s74_s25 }
  0x16   :  { %33 = vst [vmem:[#allocation5] sm:$0xf] %v32_v2 }
  0x17   :  { %p81_p11 = por %p80_p10, %p79_p9 }
  0x19   :  { %p82_p12 = pnand %p81_p11, %p75_p8 }
  0x1b   :  { %85 = shalt.err (!%p82_p12)
}
  0x1c   :  { %s86_s27 = scalar_lea.hbm %s146_s2, 64 }
  0x1d   :  { %p87_p13 = scmp.ne.s32.totalorder %s146_s2, %s86_s27  ;;  %p90_p0 = scmp.lt.u32.totalorder %s86_s27, %s146_s2 }
  0x1f   :  { %p92_p1 = pnand %p90_p0, %p87_p13 }
  0x21   :  { %95 = shalt.err (!%p92_p1)
}
  0x22   :  { %43 = dma.vmem_to_hbm [thread:$0]  %s41_s22, 64, %s146_s2, [#allocation4]  }
  0x23   :  { %98 = dma.done.wait [#allocation4], 64  }
  0x24   :  { %99 = vsyncadd [#allocation4], 4294967232 }
  0x25   :  { %47 = vsyncpa [#allocation3], 1 }
  0x26   :  { %48 = vsyncpa [#allocation4], 1 }

</bundles_post_ra>
